<compile_context>
chip_gen: v5e
topology: v5e:2x2
jax: 0.10.0
libtpu: 0.0.40
codegen_flags: <defaults>
</compile_context>

<pallas_src>
import jax
import jax.numpy as jnp
from jax.experimental import pallas as pl
from jax.experimental.pallas import tpu as pltpu


def _bahdanau_kernel(q_ref, v_ref, w1_ref, b1_ref, w2_ref, b2_ref,
                     vw_ref, vb_ref, ctx_ref, attn_ref):
    # q_ref   : (B_BLK, H)
    # v_ref   : (B_BLK, T, H)
    # w1_ref  : (H, U), b1_ref : (1, U)
    # w2_ref  : (H, U), b2_ref : (1, U)
    # vw_ref  : (1, U), vb_ref : (1, 1)
    # ctx_ref : (B_BLK, H)   -- sublane/lane-dense store
    # attn_ref: (B_BLK, T)   -- sublane/lane-dense store
    b_blk, t, h = v_ref.shape
    u = w1_ref.shape[1]

    vals = v_ref[...]                                         # (B_BLK, T, H)

    # W1(values): single (B_BLK*T, H) @ (H, U) MXU matmul (T multiple of 8 ->
    # the flatten is layout-preserving; otherwise still correct, just a copy).
    w1v = jnp.dot(vals.reshape(b_blk * t, h), w1_ref[...],
                  preferred_element_type=jnp.float32) + b1_ref[...]
    w1v = w1v.reshape(b_blk, t, u)                            # (B_BLK, T, U)

    # W2(query): (B_BLK, H) @ (H, U)
    w2q = jnp.dot(q_ref[...], w2_ref[...],
                  preferred_element_type=jnp.float32) + b2_ref[...]   # (B_BLK, U)

    s = jnp.tanh(w1v + w2q[:, None, :])                       # (B_BLK, T, U)

    # Scoring Linear (out_features=1): VPU multiply + lane reduce over U.
    score = jnp.sum(s * vw_ref[...], axis=-1) + vb_ref[...]   # (B_BLK, T)

    # softmax over the time axis (dim=1 in the PyTorch module) -> lane axis here
    m = jnp.max(score, axis=-1, keepdims=True)                # (B_BLK, 1)
    e = jnp.exp(score - m)                                     # (B_BLK, T)
    denom = jnp.sum(e, axis=-1, keepdims=True)                # (B_BLK, 1)
    attn = e * pl.reciprocal(denom, approx=True)              # EUP vrcp slot

    # context = attn-weighted sum over T, as a batched (1,T)@(T,H) MXU matmul
    # (no (B_BLK, T, H) broadcast intermediate).
    ctx = jnp.einsum('bqt,bth->bqh',
                     attn[:, None, :].astype(vals.dtype), vals,
                     preferred_element_type=jnp.float32)[:, 0, :]   # (B_BLK, H)

    ctx_ref[...] = ctx.astype(ctx_ref.dtype)
    attn_ref[...] = attn.astype(attn_ref.dtype)


def _vmem_limit_bytes():
    """Generation-aware scoped-VMEM limit: ~48 MiB on v7x (64 MiB physical),
    up to ~100 MiB on v5e/v6e (128 MiB physical)."""
    try:
        cap = int(pltpu.get_tpu_info().vmem_capacity_bytes)
    except Exception:
        cap = 64 << 20  # conservative fallback: v7x per-TensorCore VMEM
    return min(int(cap * 0.75), 100 << 20)


def _choose_b_blk(batch, seq, hidden, units, vmem_usable):
    """Largest batch block that fits the VMEM budget; whole batch if possible."""
    # Resident weight/bias blocks (double-buffered by the default pipeline).
    fixed = 2 * 4 * (2 * hidden * units + 3 * units + 1)
    # Per batch-row VMEM bytes: values/q/ctx/attn double buffers plus rough f32
    # intermediates (W1(values), tanh argument, context-matmul headroom).
    per_row = 4 * (2 * seq * hidden      # values (double buffered)
                   + 4 * hidden          # q + ctx blocks (double buffered)
                   + 2 * seq             # attn block (double buffered)
                   + 3 * seq * units     # w1v / s temporaries
                   + seq * hidden)       # context matmul headroom
    cap = max(1, (vmem_usable - fixed) // per_row)
    if cap >= batch:
        # Whole batch fits in one grid step. Only split in two when each half
        # still carries >= 512 MXU rows: negligible overhead on 1-TC chips and
        # lets v7x's two TensorCores share the "parallel" batch axis.
        half = pl.cdiv(batch, 2)
        if batch >= 16 and half * seq >= 512:
            return max(8, (half // 8) * 8)
        return batch
    # VMEM-limited: largest sublane-aligned block (multiple of 8 keeps the 2D
    # q/ctx/attn BlockSpecs layout-legal when b_blk != batch).
    if cap >= 8:
        return min(batch, (cap // 8) * 8)
    # For very large T*H, a T grid axis with online-softmax accumulation would
    # be the right fix instead of shrinking below one sublane tile.
    return min(batch, cap)


def bahdanau_attention(query, values, params, b_blk=None):
    """query: (1, B, H), values: (B, T, H). Returns (context (B, H), attn (B, T, 1))."""
    B, T, H = values.shape
    U = params["w1"].shape[1]
    dtype = values.dtype

    vmem_limit = _vmem_limit_bytes()
    if b_blk is None:
        b_blk = _choose_b_blk(B, T, H, U, int(vmem_limit * 0.8))
    n_blocks = pl.cdiv(B, b_blk)   # partial last block handled by Pallas masking

    # torch.squeeze(query, 0): (1, B, H) -> (B, H); the unsqueeze(1) broadcast
    # happens inside the kernel.
    q = query.reshape(B, H)

    b1_2d = params["b1"].reshape(1, U)
    b2_2d = params["b2"].reshape(1, U)
    vw_row = params["vw"].reshape(1, U)   # V weight as a lane row (VPU scoring)
    vb_2d = params["vb"].reshape(1, 1)

    ctx, attn2d = pl.pallas_call(
        _bahdanau_kernel,
        out_shape=(
            jax.ShapeDtypeStruct((B, H), dtype),
            jax.ShapeDtypeStruct((B, T), dtype),
        ),
        grid_spec=pltpu.PrefetchScalarGridSpec(
            num_scalar_prefetch=0,
            grid=(n_blocks,),
            in_specs=[
                pl.BlockSpec((b_blk, H), lambda i: (i, 0)),        # query (2D, dense)
                pl.BlockSpec((b_blk, T, H), lambda i: (i, 0, 0)),  # values
                pl.BlockSpec((H, U), lambda i: (0, 0)),            # W1^T
                pl.BlockSpec((1, U), lambda i: (0, 0)),            # b1
                pl.BlockSpec((H, U), lambda i: (0, 0)),            # W2^T
                pl.BlockSpec((1, U), lambda i: (0, 0)),            # b2
                pl.BlockSpec((1, U), lambda i: (0, 0)),            # V^T (row)
                pl.BlockSpec((1, 1), lambda i: (0, 0)),            # bV
            ],
            out_specs=[
                pl.BlockSpec((b_blk, H), lambda i: (i, 0)),        # context (dense)
                pl.BlockSpec((b_blk, T), lambda i: (i, 0)),        # attn (dense)
            ],
        ),
        compiler_params=pltpu.CompilerParams(
            dimension_semantics=("parallel",),
            vmem_limit_bytes=vmem_limit),
    )(q, values, params["w1"], b1_2d, params["w2"], b2_2d, vw_row, vb_2d)

    attn = attn2d.reshape(B, T, 1)   # (B, T, 1) as returned by the PyTorch module
    return ctx, attn


def _reference(query, values, params):
    """Pure-JAX reference mirroring the PyTorch forward."""
    q = jnp.squeeze(query, 0)                     # (B, H)
    hidden = q[:, None, :]                        # (B, 1, H)
    sum_1 = values @ params["w1"] + params["b1"] + hidden @ params["w2"] + params["b2"]
    score = jnp.tanh(sum_1) @ params["vw"] + params["vb"]      # (B, T, 1)
    attn = jax.nn.softmax(score, axis=1)
    ctx = jnp.sum(attn * values, axis=1)
    return ctx, attn


def _run_case(key, B, T, H, U, b_blk=None):
    k_q, k_v, k_w1, k_b1, k_w2, k_b2, k_vw, k_vb = jax.random.split(key, 8)
    scale = 1.0 / jnp.sqrt(H)
    u_scale = 1.0 / jnp.sqrt(U)
    params = {
        "w1": jax.random.uniform(k_w1, (H, U), jnp.float32, -scale, scale),
        "b1": jax.random.uniform(k_b1, (U,), jnp.float32, -scale, scale),
        "w2": jax.random.uniform(k_w2, (H, U), jnp.float32, -scale, scale),
        "b2": jax.random.uniform(k_b2, (U,), jnp.float32, -scale, scale),
        "vw": jax.random.uniform(k_vw, (U, 1), jnp.float32, -u_scale, u_scale),
        "vb": jax.random.uniform(k_vb, (1,), jnp.float32, -u_scale, u_scale),
    }
    query = jax.random.normal(k_q, (1, B, H), jnp.float32)
    values = jax.random.normal(k_v, (B, T, H), jnp.float32)

    ctx, attn = bahdanau_attention(query, values, params, b_blk=b_blk)
    jax.block_until_ready((ctx, attn))

    ctx_ref, attn_ref = _reference(query, values, params)
    assert ctx.shape == (B, H) and attn.shape == (B, T, 1)
    # pl.reciprocal(approx=True) introduces a small *relative* error in the
    # softmax normalization (common multiplicative factor), hence rtol-based check.
    assert jnp.allclose(ctx, ctx_ref, atol=1e-4, rtol=1e-2)
    assert jnp.allclose(attn, attn_ref, atol=1e-4, rtol=1e-2)


if __name__ == "__main__":
    key = jax.random.PRNGKey(0)
    k0, k1, k2 = jax.random.split(key, 3)

    # Primary case: batch=2, seq=8, hidden=32, units=16 -> single grid step.
    _run_case(k0, B=2, T=8, H=32, U=16)
    # Odd batch: still a single step, no padding anywhere.
    _run_case(k1, B=5, T=8, H=32, U=16)
    # Forced multi-step grid with sublane-aligned (8-row) batch blocks.
    _run_case(k2, B=16, T=8, H=32, U=16, b_blk=8)

    print("KERNEL_OK")
</pallas_src>

<mosaic_0001>
module attributes {stable_mosaic.version = 11 : i64} {
  func.func @_bahdanau_kernel(%arg0: i32, %arg1: memref<2x32xf32, #tpu.memory_space<vmem>>, %arg2: memref<2x8x32xf32, #tpu.memory_space<vmem>>, %arg3: memref<32x16xf32, #tpu.memory_space<vmem>>, %arg4: memref<1x16xf32, #tpu.memory_space<vmem>>, %arg5: memref<32x16xf32, #tpu.memory_space<vmem>>, %arg6: memref<1x16xf32, #tpu.memory_space<vmem>>, %arg7: memref<1x16xf32, #tpu.memory_space<vmem>>, %arg8: memref<1x1xf32, #tpu.memory_space<vmem>>, %arg9: memref<2x32xf32, #tpu.memory_space<vmem>>, %arg10: memref<2x8xf32, #tpu.memory_space<vmem>>) attributes {dimension_semantics = [#tpu.dimension_semantics<parallel>], iteration_bounds = array<i64: 1>, scalar_prefetch = 0 : i64, scratch_operands = 0 : i64, tpu.core_type = #tpu.core_type<tc>, window_params = [{transform_indices = @transform_0, window_bounds = array<i64: 2, 32>}, {transform_indices = @transform_1, window_bounds = array<i64: 2, 8, 32>}, {pipeline_mode = #tpu.pipeline_mode<synchronous>, transform_indices = @transform_2, window_bounds = array<i64: 32, 16>}, {pipeline_mode = #tpu.pipeline_mode<synchronous>, transform_indices = @transform_3, window_bounds = array<i64: 1, 16>}, {pipeline_mode = #tpu.pipeline_mode<synchronous>, transform_indices = @transform_4, window_bounds = array<i64: 32, 16>}, {pipeline_mode = #tpu.pipeline_mode<synchronous>, transform_indices = @transform_5, window_bounds = array<i64: 1, 16>}, {pipeline_mode = #tpu.pipeline_mode<synchronous>, transform_indices = @transform_6, window_bounds = array<i64: 1, 16>}, {pipeline_mode = #tpu.pipeline_mode<synchronous>, transform_indices = @transform_7, window_bounds = array<i64: 1, 1>}, {transform_indices = @transform_8, window_bounds = array<i64: 2, 32>}, {transform_indices = @transform_9, window_bounds = array<i64: 2, 8>}]} {
    %c0 = arith.constant 0 : index
    %c0_0 = arith.constant 0 : index
    %c0_1 = arith.constant 0 : index
    %0 = vector.load %arg2[%c0, %c0_0, %c0_1] : memref<2x8x32xf32, #tpu.memory_space<vmem>>, vector<2x8x32xf32>
    %1 = vector.shape_cast %0 : vector<2x8x32xf32> to vector<16x32xf32>
    %c0_2 = arith.constant 0 : index
    %c0_3 = arith.constant 0 : index
    %2 = vector.load %arg3[%c0_2, %c0_3] : memref<32x16xf32, #tpu.memory_space<vmem>>, vector<32x16xf32>
    %cst = arith.constant dense<0.000000e+00> : vector<16x16xf32>
    %3 = tpu.matmul %1, %2, %cst {dimension_numbers = #tpu.dot_dimension_numbers<[1], [0], [0], [1], [0, 0, 1, 1], [], []>} : vector<16x32xf32>, vector<32x16xf32>, vector<16x16xf32> -> vector<16x16xf32>
    %c0_4 = arith.constant 0 : index
    %c0_5 = arith.constant 0 : index
    %4 = vector.load %arg4[%c0_4, %c0_5] : memref<1x16xf32, #tpu.memory_space<vmem>>, vector<1x16xf32>
    %5 = vector.broadcast %4 : vector<1x16xf32> to vector<16x16xf32>
    %6 = arith.addf %3, %5 : vector<16x16xf32>
    %7 = vector.shape_cast %6 : vector<16x16xf32> to vector<2x8x16xf32>
    %c0_6 = arith.constant 0 : index
    %c0_7 = arith.constant 0 : index
    %8 = vector.load %arg1[%c0_6, %c0_7] : memref<2x32xf32, #tpu.memory_space<vmem>>, vector<2x32xf32>
    %c0_8 = arith.constant 0 : index
    %c0_9 = arith.constant 0 : index
    %9 = vector.load %arg5[%c0_8, %c0_9] : memref<32x16xf32, #tpu.memory_space<vmem>>, vector<32x16xf32>
    %cst_10 = arith.constant dense<0.000000e+00> : vector<2x16xf32>
    %10 = tpu.matmul %8, %9, %cst_10 {dimension_numbers = #tpu.dot_dimension_numbers<[1], [0], [0], [1], [0, 0, 1, 1], [], []>} : vector<2x32xf32>, vector<32x16xf32>, vector<2x16xf32> -> vector<2x16xf32>
    %c0_11 = arith.constant 0 : index
    %c0_12 = arith.constant 0 : index
    %11 = vector.load %arg6[%c0_11, %c0_12] : memref<1x16xf32, #tpu.memory_space<vmem>>, vector<1x16xf32>
    %12 = vector.broadcast %11 : vector<1x16xf32> to vector<2x16xf32>
    %13 = arith.addf %10, %12 : vector<2x16xf32>
    %14 = vector.shape_cast %13 : vector<2x16xf32> to vector<2x1x16xf32>
    %15 = vector.broadcast %14 : vector<2x1x16xf32> to vector<2x8x16xf32>
    %16 = arith.addf %7, %15 : vector<2x8x16xf32>
    %17 = math.tanh %16 : vector<2x8x16xf32>
    %c0_13 = arith.constant 0 : index
    %c0_14 = arith.constant 0 : index
    %18 = vector.load %arg7[%c0_13, %c0_14] : memref<1x16xf32, #tpu.memory_space<vmem>>, vector<1x16xf32>
    %19 = vector.shape_cast %18 : vector<1x16xf32> to vector<1x1x16xf32>
    %20 = vector.broadcast %19 : vector<1x1x16xf32> to vector<2x8x16xf32>
    %21 = arith.mulf %17, %20 : vector<2x8x16xf32>
    %cst_15 = arith.constant dense<0.000000e+00> : vector<2x8xf32>
    %22 = vector.multi_reduction <add>, %21, %cst_15 [2] : vector<2x8x16xf32> to vector<2x8xf32>
    %c0_16 = arith.constant 0 : index
    %c0_17 = arith.constant 0 : index
    %23 = vector.load %arg8[%c0_16, %c0_17] : memref<1x1xf32, #tpu.memory_space<vmem>>, vector<1x1xf32>
    %24 = vector.broadcast %23 : vector<1x1xf32> to vector<2x8xf32>
    %25 = arith.addf %22, %24 : vector<2x8xf32>
    %cst_18 = arith.constant dense<0xFF800000> : vector<2xf32>
    %26 = vector.multi_reduction <maximumf>, %25, %cst_18 [1] : vector<2x8xf32> to vector<2xf32>
    %27 = vector.shape_cast %26 : vector<2xf32> to vector<2x1xf32>
    %28 = vector.broadcast %27 : vector<2x1xf32> to vector<2x8xf32>
    %29 = arith.subf %25, %28 : vector<2x8xf32>
    %30 = math.exp %29 : vector<2x8xf32>
    %cst_19 = arith.constant dense<0.000000e+00> : vector<2xf32>
    %31 = vector.multi_reduction <add>, %30, %cst_19 [1] : vector<2x8xf32> to vector<2xf32>
    %32 = vector.shape_cast %31 : vector<2xf32> to vector<2x1xf32>
    %33 = tpu.reciprocal %32 {approx = true} : vector<2x1xf32> -> vector<2x1xf32>
    %34 = vector.broadcast %33 : vector<2x1xf32> to vector<2x8xf32>
    %35 = arith.mulf %30, %34 : vector<2x8xf32>
    %36 = vector.shape_cast %35 : vector<2x8xf32> to vector<2x1x8xf32>
    "tpu.trace_start"() <{level = 10 : i32, message = "bqt,bth->bqh"}> : () -> ()
    %cst_20 = arith.constant dense<0.000000e+00> : vector<2x1x32xf32>
    %37 = tpu.matmul %36, %0, %cst_20 {dimension_numbers = #tpu.dot_dimension_numbers<[2], [1], [1], [2], [0, 0, 0, 1, 1, 2], [0], [0]>} : vector<2x1x8xf32>, vector<2x8x32xf32>, vector<2x1x32xf32> -> vector<2x1x32xf32>
    "tpu.trace_stop"() : () -> ()
    %38 = vector.shape_cast %37 : vector<2x1x32xf32> to vector<2x32xf32>
    %c0_21 = arith.constant 0 : index
    %c0_22 = arith.constant 0 : index
    %39 = vector.load %arg9[%c0_21, %c0_22] : memref<2x32xf32, #tpu.memory_space<vmem>>, vector<2x32xf32>
    tpu.vector_store %arg9[%c0_21, %c0_22], %38 {strides = array<i32>} : memref<2x32xf32, #tpu.memory_space<vmem>>, vector<2x32xf32>,
    %c0_23 = arith.constant 0 : index
    %c0_24 = arith.constant 0 : index
    %40 = vector.load %arg10[%c0_23, %c0_24] : memref<2x8xf32, #tpu.memory_space<vmem>>, vector<2x8xf32>
    tpu.vector_store %arg10[%c0_23, %c0_24], %35 {strides = array<i32>} : memref<2x8xf32, #tpu.memory_space<vmem>>, vector<2x8xf32>,
    return
  }
  func.func @transform_0(%arg0: i32) -> (i32, i32) {
    %c0_i32 = arith.constant 0 : i32
    %c0_i32_0 = arith.constant 0 : i32
    return %arg0, %c0_i32 : i32, i32
  }
  func.func @transform_1(%arg0: i32) -> (i32, i32, i32) {
    %c0_i32 = arith.constant 0 : i32
    %c0_i32_0 = arith.constant 0 : i32
    %c0_i32_1 = arith.constant 0 : i32
    return %arg0, %c0_i32, %c0_i32_0 : i32, i32, i32
  }
  func.func @transform_2(%arg0: i32) -> (i32, i32) {
    %c0_i32 = arith.constant 0 : i32
    %c0_i32_0 = arith.constant 0 : i32
    %c0_i32_1 = arith.constant 0 : i32
    return %c0_i32, %c0_i32_0 : i32, i32
  }
  func.func @transform_3(%arg0: i32) -> (i32, i32) {
    %c0_i32 = arith.constant 0 : i32
    %c0_i32_0 = arith.constant 0 : i32
    %c0_i32_1 = arith.constant 0 : i32
    return %c0_i32, %c0_i32_0 : i32, i32
  }
  func.func @transform_4(%arg0: i32) -> (i32, i32) {
    %c0_i32 = arith.constant 0 : i32
    %c0_i32_0 = arith.constant 0 : i32
    %c0_i32_1 = arith.constant 0 : i32
    return %c0_i32, %c0_i32_0 : i32, i32
  }
  func.func @transform_5(%arg0: i32) -> (i32, i32) {
    %c0_i32 = arith.constant 0 : i32
    %c0_i32_0 = arith.constant 0 : i32
    %c0_i32_1 = arith.constant 0 : i32
    return %c0_i32, %c0_i32_0 : i32, i32
  }
  func.func @transform_6(%arg0: i32) -> (i32, i32) {
    %c0_i32 = arith.constant 0 : i32
    %c0_i32_0 = arith.constant 0 : i32
    %c0_i32_1 = arith.constant 0 : i32
    return %c0_i32, %c0_i32_0 : i32, i32
  }
  func.func @transform_7(%arg0: i32) -> (i32, i32) {
    %c0_i32 = arith.constant 0 : i32
    %c0_i32_0 = arith.constant 0 : i32
    %c0_i32_1 = arith.constant 0 : i32
    return %c0_i32, %c0_i32_0 : i32, i32
  }
  func.func @transform_8(%arg0: i32) -> (i32, i32) {
    %c0_i32 = arith.constant 0 : i32
    %c0_i32_0 = arith.constant 0 : i32
    return %arg0, %c0_i32 : i32, i32
  }
  func.func @transform_9(%arg0: i32) -> (i32, i32) {
    %c0_i32 = arith.constant 0 : i32
    %c0_i32_0 = arith.constant 0 : i32
    return %arg0, %c0_i32 : i32, i32
  }
}

</mosaic_0001>

<bundles_post_ra>
// kernel: tpu_custom_call.1
= control target key start
LH: loop header
LB: loop body
LE: loop exit
PB: predicated region body
PF: predicated region fallthrough
CT: control target
= control target key end

     0   :  { %s471_s0 = inlined_call_operand.vmem [shape: f32[2,32], index: 0, kind: input, shape index: {}]   ;;  %s472_s1 = inlined_call_operand.vmem [shape: f32[2,8,32], index: 1, kind: input, shape index: {}]   ;;  %s473_s2 = inlined_call_operand.vmem [shape: f32[32,16], index: 2, kind: input, shape index: {}]   ;;  %s474_s3 = inlined_call_operand.vmem [shape: f32[1,16], index: 3, kind: input, shape index: {}]   ;;  %s475_s4 = inlined_call_operand.vmem [shape: f32[32,16], index: 4, kind: input, shape index: {}]   ;;  %s476_s5 = inlined_call_operand.vmem [shape: f32[1,16], index: 5, kind: input, shape index: {}]   ;;  %s477_s6 = inlined_call_operand.vmem [shape: f32[1,16], index: 6, kind: input, shape index: {}]   ;;  %s478_s7 = inlined_call_operand.<no memory space> [shape: f32[1,1], index: 7, kind: input, shape index: {}]   ;;  %s479_s8 = inlined_call_operand.hbm [shape: f32[2,32], index: 8, kind: output, shape index: {0}]   ;;  %s480_s9 = inlined_call_operand.hbm [shape: f32[2,8], index: 9, kind: output, shape index: {1}]  }
   0x1   :  { %v15_v0 = vstv %s478_s7 }
   0x2   :  { %16 = vst [vmem:[#allocation2] sm:$0x1] %v15_v0 }
   0x3   :  { %17 = vsyncpa [#allocation4], 0  ;;  %v40_v1 = vld [vmem:[%s473_s2 + $0x18] sm:$0xff]  ;;  %v39_v3 = vld [vmem:[%s473_s2 + $0x10] sm:$0xff]  ;;  %vm45_vm0 = vcmask 261120  }
   0x4   :  { %v79_v2 = vld [vmem:[%s475_s4 + $0x18] sm:$0xff]  ;;  %64 = vmatpush.msra.mxu0 %v40_v1  ;;  %v78_v4 = vld [vmem:[%s475_s4 + $0x10] sm:$0xff]  ;;  %v38_v5 = vld [vmem:[%s473_s2 + $0x8] sm:$0xff] }
   0x5   :  { %99 = vmatpush.msra.mxu1 %v79_v2  ;;  %v77_v6 = vld [vmem:[%s475_s4 + $0x8] sm:$0xff]  ;;  %v37_v7 = vld [vmem:[%s473_s2] sm:$0xff] }
   0x6   :  { %65 = vmatpush.msra.mxu0 %v39_v3  ;;  %v35_v8 = vld [vmem:[%s472_s1] sm:$0xff]  ;;  %v36_v9 = vld [vmem:[%s472_s1 + $0x8] sm:$0xff] }
   0x7   :  { %100 = vmatpush.msra.mxu1 %v78_v4  ;;  %v76_v10 = vld [vmem:[%s475_s4] sm:$0xff]  ;;  %236 = vmatpush.msra.mxu3 %v36_v9 }
   0x8   :  { %209 = vmatpush.msra.mxu2 %v35_v8  ;;  %66 = vmatpush.msra.mxu0 %v38_v5  ;;  %v75_v11 = vld [vmem:[%s471_s0] sm:$0x3] }
   0x9   :  { %101 = vmatpush.msra.mxu1 %v77_v6 }
   0xa   :  { %18 = vsyncpa [#allocation6], 0  ;;  %67 = vmatpush.msra.mxu0 %v37_v7  ;;  %v360_v12 = vmov 0   ;;  %v297_v13 = vld [vmem:[#allocation2] ss:$0 sm:$0xff]  ;;  %vm123_vm1 = vcmask 130048   ;;  %v141_v35 = vlaneseq }
   0xb   :  { %102 = vmatpush.msra.mxu1 %v76_v10  ;;  %283 = vmatmul.msk.f32.vlgmr.msra.gmra.mxu0 %vm45_vm0, %v35_v8  ;;  %v294_v14 = vld [vmem:[%s474_s3] ss:$0 sm:$0xff]  ;;  %vm145_vm2 = vcmask 1041409   ;;  %vm148_vm3 = vcmask 58368   ;;  %vm191_vm4 = vcmask 64512   ;;  %s361_s3 = smov [#allocation5]  }
   0xc   :  { %285 = vmatmul.msk.f32.vlgmr.msra.gmra.mxu1 %vm45_vm0, %v75_v11  ;;  %291 = vset.pattern.permute.xlu1 %v360_v12  ;;  %v295_v15 = vld [vmem:[%s476_s5] ss:$0 sm:$0xff]  ;;  %v142_v37 = vand.u32 127, %v141_v35  ;;  %s267_s5 = sshll.u32 %s361_s3, 4  ;;  %s269_s14 = sshll.u32 %s480_s9, 4  ;;  %vm246_vm5 = vcmask 254976   ;;  %s268_s5 = int_to_ptr.vmem [resolvable:$true] %s267_s5  ;;  %s270_s14 = int_to_ptr.hbm [resolvable:$true] %s269_s14 }
   0xd   :  { %292 = vset.pattern.permute.xlu2 %v360_v12  ;;  %293 = vset.pattern.permute.xlu0 %v360_v12  ;;  %v296_v26 = vld [vmem:[%s477_s6] ss:$0 sm:$0xff]  ;;  %s362_s15 = smov [#allocation3]   ;;  %s258_s7 = sshll.u32 %s479_s8, 4  ;;  %s259_s7 = int_to_ptr.hbm [resolvable:$true] %s258_s7 }
   0xe   :  { %134 = vperm.xlu1 %291, %v297_v13   ;;  %s256_s16 = sshll.u32 %s362_s15, 4  ;;  %s257_s16 = int_to_ptr.vmem [resolvable:$true] %s256_s16 }
  0x13   :  { %284 = vmatmul.msk.f32.gmra.mxu0 %vm45_vm0, %v36_v9 }
  0x80   :  { %v135_v36 = vpop.permute.xlu1 %134 }
  0x88   :  { %v69_v16 = vpop.f32.mrf.mxu0 }
  0x89   :  { %v104_v17 = vpop.f32.mrf.mxu1  ;;  %v70_v18 = vadd.f32 %v294_v14, %v69_v16 }
  0x8a   :  { %v105_v19 = vadd.f32 %v295_v15, %v104_v17 }
  0x8c   :  { %v109_v20 = vperm.slane %v105_v19, 0  ;;  %v108_v21 = vrot.slane %v105_v19, 1 }
  0x8e   :  { %v113_v22 = vadd.f32 %v109_v20, %v70_v18  ;;  %v110_v24 = vperm.slane %v108_v21, 0 }
  0x90   :  { %298 = vtanh.f32 %v113_v22  ;;  %v72_v23 = vpop.f32.mrf.mxu0 }
  0x91   :  { %v73_v25 = vadd.f32 %v294_v14, %v72_v23 }
  0x93   :  { %v114_v27 = vadd.f32 %v110_v24, %v73_v25 }
  0x95   :  { %300 = vtanh.f32 %v114_v27 }
  0x96   :  { %v299_v28 = vpop.eup %298 }
  0x97   :  { %v121_v29 = vmul.f32 %v299_v28, %v296_v26 }
  0x99   :  { %v124_v30 = vsel %vm123_vm1, %v121_v29, 0.0 }
  0x9a   :  { %125 = vadd.xlane.f32.xlu0 %v124_v30 }
  0x9b   :  { %v301_v31 = vpop.eup %300 }
  0x9c   :  { %v122_v32 = vmul.f32 %v301_v31, %v296_v26 }
  0x9e   :  { %v127_v33 = vsel %vm123_vm1, %v122_v32, 0.0 }
  0xa2   :  { %128 = vadd.xlane.f32.xlu0 %v127_v33 }
 0x10d   :  { %v126_v34 = vpop.xlane.xlu0 %125 }
 0x10e   :  { %v137_v38 = vadd.f32 %v135_v36, %v126_v34 }
 0x110   :  { %v143_v41 = vperm.slane %v137_v38, %v142_v37 }
 0x115   :  { %v129_v39 = vpop.xlane.xlu0 %128 }
 0x116   :  { %v138_v40 = vadd.f32 %v135_v36, %v129_v39 }
 0x118   :  { %v144_v42 = vperm.slane %v138_v40, %v142_v37 }
 0x11a   :  { %v146_v43 = vsel %vm145_vm2, %v144_v42, %v143_v41 }
 0x11b   :  { %v149_v44 = vsel %vm148_vm3, %v146_v43, -inf }
 0x11c   :  { %150 = vmax.xlane.f32.xlu1 %v149_v44 }
 0x18f   :  { %v151_v45 = vpop.xlane.xlu1 %150 }
 0x190   :  { %v153_v46 = vperm.slane %v151_v45, 0  ;;  %v154_v47 = vperm.slane %v151_v45, 1 }
 0x192   :  { %v157_v48 = vsub.f32 %v137_v38, %v153_v46  ;;  %v158_v50 = vsub.f32 %v138_v40, %v154_v47 }
 0x194   :  { %v159_v49 = vmul.f32 1.442695, %v157_v48  ;;  %v161_v51 = vmul.f32 1.442695, %v158_v50 }
 0x196   :  { %302 = vpow2.f32 %v159_v49 }
 0x197   :  { %304 = vpow2.f32 %v161_v51 }
 0x19c   :  { %v303_v52 = vpop.eup %302 }
 0x19d   :  { %166 = vperm.xlu2 %292, %v303_v52   ;;  %v305_v53 = vpop.eup %304 }
 0x1a5   :  { %169 = vperm.xlu2 %292, %v305_v53  }
 0x1f7   :  { %v167_v54 = vpop.permute.xlu2 %166 }
 0x1f8   :  { %v171_v56 = vperm.slane %v167_v54, %v142_v37 }
 0x1ff   :  { %v170_v55 = vpop.permute.xlu2 %169 }
 0x200   :  { %v172_v57 = vperm.slane %v170_v55, %v142_v37 }
 0x202   :  { %v173_v58 = vsel %vm145_vm2, %v172_v57, %v171_v56 }
 0x203   :  { %v175_v59 = vsel %vm148_vm3, %v173_v58, 0.0 }
 0x204   :  { %176 = vadd.xlane.f32.xlu0 %v175_v59 }
 0x277   :  { %v177_v60 = vpop.xlane.xlu0 %176 }
 0x278   :  { %306 = vrcp.f32 %v177_v60 }
 0x27e   :  { %v307_v61 = vpop.eup %306 }
 0x27f   :  { %v181_v62 = vperm.slane %v307_v61, 1  ;;  %v180_v63 = vperm.slane %v307_v61, 0 }
 0x281   :  { %v185_v0 = vmul.f32 %v305_v53, %v181_v62  ;;  %v184_v1 = vmul.f32 %v303_v52, %v180_v63 }
 0x283   :  { %216 = vperm.xlu2 %292, %v185_v0   ;;  %188 = vperm.xlu0 %293, %v184_v1  }
 0x2dd   :  { %v217_v2 = vpop.permute.xlu2 %216 }
 0x2de   :  { %v218_v3 = vperm.slane %v217_v2, %v142_v37 }
 0x2e0   :  { %287 = vmatmul.msk.f32.vlgmr.msra.gmra.mxu3 %vm191_vm4, %v218_v3 }
 0x2f5   :  { %v189_v4 = vpop.permute.xlu0 %188 }
 0x2f6   :  { %v190_v5 = vperm.slane %v189_v4, %v142_v37 }
 0x2f8   :  { %286 = vmatmul.msk.f32.vlgmr.msra.gmra.mxu2 %vm191_vm4, %v190_v5  ;;  %v248_v6 = vsel %vm145_vm2, %v218_v3, %v190_v5 }
 0x2f9   :  { %250 = vst.msk [vmem:[#allocation5] sm:$0x3] %vm148_vm3, %v248_v6 }
 0x2fa   :  { %272 = dma.vmem_to_hbm [thread:$0]  %s268_s5, 32, %s270_s14, [#allocation6]  }
 0x363   :  { %v238_v7 = vpop.f32.mrf.mxu3 }
 0x364   :  { %v243_v8 = vrot.slane %v238_v7, 7 }
 0x37b   :  { %v211_v9 = vpop.f32.mrf.mxu2 }
 0x37c   :  { %v244_v10 = vsel %vm145_vm2, %v243_v8, %v211_v9 }
 0x37d   :  { %247 = vst.msk [vmem:[#allocation3] sm:$0x3] %vm246_vm5, %v244_v10 }
 0x37e   :  { %261 = dma.vmem_to_hbm [thread:$0]  %s257_s16, 32, %s259_s7, [#allocation4]  }
 0x37f   :  { %356 = dma.done.wait [#allocation4], 32  }
 0x380   :  { %357 = vsyncadd [#allocation4], 4294967264 }
 0x381   :  { %358 = dma.done.wait [#allocation6], 32  }
 0x382   :  { %359 = vsyncadd [#allocation6], 4294967264 }
 0x383   :  { %281 = vsyncpa [#allocation4], 1 }
 0x384   :  { %282 = vsyncpa [#allocation6], 1 }

</bundles_post_ra>
